<compile_context>
chip_gen: v5e
topology: v5e:2x2
jax: 0.10.0
libtpu: 0.0.40
codegen_flags: <defaults>
</compile_context>

<pallas_src>
import functools
import math

import jax
import jax.numpy as jnp
from jax.experimental import pallas as pl
from jax.experimental.pallas import tpu as pltpu


# ----------------------------------------------------------------------------
# Kernels
# ----------------------------------------------------------------------------
def gru_cell_kernel(x_ref, h_ref, wx_ref, wh_ref, bgx_ref, bhn_ref, out_ref, *, hp):
    """Single GRU cell step (matches GRUCellv2.forward). Gate math in f32."""
    h32 = h_ref[...].astype(jnp.float32)                       # (B, Hp) f32 blend term

    # Two fused MXU pushes over the lane-dense [r|z|n] axis, f32 accumulation.
    # (Set precision=jax.lax.Precision.HIGHEST with f32 params for bit-exactness.)
    gx = jnp.dot(x_ref[...], wx_ref[...],
                 preferred_element_type=jnp.float32) + bgx_ref[...]   # (B, 3Hp)
    gh = jnp.dot(h32.astype(wh_ref.dtype), wh_ref[...],
                 preferred_element_type=jnp.float32)                  # (B, 3Hp)

    # sigmoid(x) == 0.5*(tanh(x/2)+1): keeps the transcendental on the EUP slot.
    rz = 0.5 * (jnp.tanh(0.5 * (gx[:, :2 * hp] + gh[:, :2 * hp])) + 1.0)
    r = rz[:, :hp]
    z = rz[:, hp:]
    # Candidate gate: bh_n must stay inside the r*(...) term.
    n = jnp.tanh(gx[:, 2 * hp:] + r * (gh[:, 2 * hp:] + bhn_ref[...]))

    out_ref[...] = ((1.0 - z) * n + z * h32).astype(out_ref.dtype)


def input_proj_kernel(x_ref, wx_ref, b_ref, gx_ref):
    """Hoisted input projection: one big matmul + x-side bias fold."""
    gx_ref[...] = (jnp.dot(x_ref[...], wx_ref[...],
                           preferred_element_type=jnp.float32)
                   + b_ref[...]).astype(gx_ref.dtype)


def gru_seq_kernel(gx_ref, h0_ref, wh_ref, bhn_ref, hs_ref, h_acc, *, hp, tt):
    """`tt` GRU steps per grid step. Only the h-recurrent matmul is inside the
    serial loop; wh/bh_n stay VMEM-resident, h carried in a f32 VMEM scratch."""
    @pl.when(pl.program_id(1) == 0)                 # first time-block of this batch slice
    def _():
        h_acc[...] = h0_ref[...].astype(jnp.float32)

    wh = wh_ref[...]                                # hoisted resident weight load
    bhn = bhn_ref[...]
    h = h_acc[...]                                  # (bb, Hp) f32 carry
    for i in range(tt):                             # static, fully unrolled
        gx = gx_ref[i]                              # (bb, 3Hp) f32, x-biases pre-folded
        gh = jnp.dot(h.astype(wh.dtype), wh, preferred_element_type=jnp.float32)
        rz = 0.5 * (jnp.tanh(0.5 * (gx[:, :2 * hp] + gh[:, :2 * hp])) + 1.0)
        r = rz[:, :hp]
        z = rz[:, hp:]
        n = jnp.tanh(gx[:, 2 * hp:] + r * (gh[:, 2 * hp:] + bhn))
        h = (1.0 - z) * n + z * h
        hs_ref[i] = h.astype(hs_ref.dtype)
    h_acc[...] = h


# ----------------------------------------------------------------------------
# Wrappers
# ----------------------------------------------------------------------------
def gru_cell_forward(x, h_pad, wx_f, wh_f, b_gx, bh_n):
    """x:(B,In), h_pad:(B,Hp), wx_f:(In,3Hp), wh_f:(Hp,3Hp), b_gx:(1,3Hp),
    bh_n:(1,Hp). Returns next hidden, padded: (B,Hp) f32."""
    B, Hp = h_pad.shape
    op_dtype = wx_f.dtype
    vmem = pl.BlockSpec(memory_space=pltpu.MemorySpace.VMEM)
    kernel = functools.partial(gru_cell_kernel, hp=Hp)
    return pl.pallas_call(
        kernel,
        out_shape=jax.ShapeDtypeStruct((B, Hp), jnp.float32),
        in_specs=[vmem] * 6,
        out_specs=vmem,
    )(x.astype(op_dtype), h_pad, wx_f, wh_f, b_gx, bh_n)


def input_projection(x_flat, wx_f, b_gx):
    """(R, In) @ (In, 3Hp) + b_gx -> (R, 3Hp) f32, one MXU-friendly matmul."""
    R = x_flat.shape[0]
    Gp = wx_f.shape[1]
    vmem = pl.BlockSpec(memory_space=pltpu.MemorySpace.VMEM)
    # TODO(synk): tile the R axis with a grid for very large T*B.
    return pl.pallas_call(
        input_proj_kernel,
        out_shape=jax.ShapeDtypeStruct((R, Gp), jnp.float32),
        in_specs=[vmem, vmem, vmem],
        out_specs=vmem,
    )(x_flat, wx_f, b_gx)


def gru_sequence_forward(xs, h0_pad, wx_f, wh_f, b_gx, bh_n, *,
                         tt=None, bb=None, out_dtype=jnp.float32):
    """xs:(T,B,In), h0_pad:(B,Hp). Returns all hidden states, padded: (T,B,Hp)."""
    T, B, In = xs.shape
    Hp = h0_pad.shape[-1]
    Gp = 3 * Hp
    op_dtype = wx_f.dtype

    # 1) Hoisted input projection: one (T*B, In) x (In, 3Hp) matmul, biases folded.
    gx = input_projection(xs.astype(op_dtype).reshape(T * B, In), wx_f, b_gx)
    gx = gx.reshape(T, B, Gp)

    # 2) Timestep-blocked recurrence.
    if tt is None:
        tt = T if T <= 16 else 8
    if bb is None:
        bb = B            # set bb=B//2 on v7x when B >= 16 to use both TensorCores
    assert T % tt == 0 and B % bb == 0

    kernel = functools.partial(gru_seq_kernel, hp=Hp, tt=tt)
    return pl.pallas_call(
        kernel,
        out_shape=jax.ShapeDtypeStruct((T, B, Hp), out_dtype),
        grid_spec=pltpu.PrefetchScalarGridSpec(
            num_scalar_prefetch=0,
            grid=(B // bb, T // tt),                               # (batch, time) blocks
            in_specs=[
                pl.BlockSpec((tt, bb, Gp), lambda b, s: (s, b, 0)),  # per-time-block gx
                pl.BlockSpec((bb, Hp), lambda b, s: (b, 0)),         # h0 slice
                pl.BlockSpec(wh_f.shape, lambda b, s: (0, 0)),       # resident weights
                pl.BlockSpec(bh_n.shape, lambda b, s: (0, 0)),       # resident bias
            ],
            out_specs=pl.BlockSpec((tt, bb, Hp), lambda b, s: (s, b, 0)),
            scratch_shapes=[pltpu.VMEM((bb, Hp), jnp.float32)],      # carried hidden
        ),
        compiler_params=pltpu.CompilerParams(
            # batch slices independent (megacore), time carried (sequential)
            dimension_semantics=("parallel", "arbitrary")),
        # NOTE(v7x, large H): keep weights bf16/fp8, set vmem_limit_bytes, and
        # N-tile the 3Hp axis once Hp*3Hp weights approach the 64 MiB VMEM.
    )(gx, h0_pad, wh_f, bh_n)


# ----------------------------------------------------------------------------
# Parameter prep (one-time, host side) and pure-JAX references
# ----------------------------------------------------------------------------
def init_params(key, input_size, hidden_size):
    lb = -math.sqrt(1.0 / hidden_size)
    ub = math.sqrt(1.0 / hidden_size)
    k = jax.random.split(key, 4)
    wx = jax.random.uniform(k[0], (3, input_size, hidden_size), jnp.float32, lb, ub)
    wh = jax.random.uniform(k[1], (3, hidden_size, hidden_size), jnp.float32, lb, ub)
    bx = jax.random.uniform(k[2], (3, 1, hidden_size), jnp.float32, lb, ub)
    bh = jax.random.uniform(k[3], (3, 1, hidden_size), jnp.float32, lb, ub)
    return wx, wh, bx, bh


def prepare_params(wx, wh, bx, bh, *, lane=128, param_dtype=jnp.bfloat16):
    """Fuse the 3 per-gate weight matrices into lane-dense (·, 3*Hp) operands.

    Gate order along the fused axis is [r | z | n], each padded to
    Hp = round_up(H, lane).  INVARIANT: padded weight columns and bias lanes are
    exactly zero — the kernels rely on this to keep padded hidden lanes at 0
    through the recurrence (sigmoid(0)=0.5, tanh(0)=0 -> 0.5*0 + 0.5*0 = 0).
    r/z biases are pre-folded (bx+bh); for the candidate gate only bx_n is folded
    into the x-side bias (bh_n must stay inside the r*(...) term).
    Use lane=256 on v6e/v7x when H >= 256 (256-wide MXU N tiles).
    """
    _, input_size, hidden_size = wx.shape
    hp = ((hidden_size + lane - 1) // lane) * lane
    wx_p = jnp.zeros((3, input_size, hp), jnp.float32).at[:, :, :hidden_size].set(wx)
    wh_p = jnp.zeros((3, hp, hp), jnp.float32).at[:, :hidden_size, :hidden_size].set(wh)
    wx_f = jnp.transpose(wx_p, (1, 0, 2)).reshape(input_size, 3 * hp)
    wh_f = jnp.transpose(wh_p, (1, 0, 2)).reshape(hp, 3 * hp)
    b_gx = jnp.zeros((3, hp), jnp.float32)
    b_gx = b_gx.at[:2, :hidden_size].set((bx[:2] + bh[:2])[:, 0, :])
    b_gx = b_gx.at[2, :hidden_size].set(bx[2, 0, :])
    b_gx = b_gx.reshape(1, 3 * hp)
    bh_n = jnp.zeros((1, hp), jnp.float32).at[:, :hidden_size].set(bh[2])
    return wx_f.astype(param_dtype), wh_f.astype(param_dtype), b_gx, bh_n, hp


def pad_hidden(h, hp):
    B, H = h.shape
    return jnp.zeros((B, hp), h.dtype).at[:, :H].set(h)


def reference_forward(x, h, wx, wh, bx, bh):
    r = jax.nn.sigmoid(x @ wx[0] + bx[0] + h @ wh[0] + bh[0])
    z = jax.nn.sigmoid(x @ wx[1] + bx[1] + h @ wh[1] + bh[1])
    n = jnp.tanh(x @ wx[2] + bx[2] + r * (h @ wh[2] + bh[2]))
    return (1.0 - z) * n + z * h


def reference_sequence(xs, h0, wx, wh, bx, bh):
    def step(h, x):
        h_new = reference_forward(x, h, wx, wh, bx, bh)
        return h_new, h_new
    _, hs = jax.lax.scan(step, h0, xs)
    return hs


# ----------------------------------------------------------------------------
if __name__ == "__main__":
    batch = 8
    input_size = 16
    hidden_size = 32
    seq_len = 8

    key = jax.random.PRNGKey(0)
    kx, kh, kp, ks = jax.random.split(key, 4)
    x = jax.random.normal(kx, (batch, input_size), jnp.float32)
    h = jax.random.normal(kh, (batch, hidden_size), jnp.float32)
    wx, wh, bx, bh = init_params(kp, input_size, hidden_size)
    ref = reference_forward(x, h, wx, wh, bx, bh)

    # f32-operand params (accuracy check) and bf16 default (fast MXU path).
    p32 = prepare_params(wx, wh, bx, bh, lane=128, param_dtype=jnp.float32)
    pbf = prepare_params(wx, wh, bx, bh, lane=128, param_dtype=jnp.bfloat16)
    Hp = p32[-1]
    h_pad = pad_hidden(h, Hp)

    # ---- single cell (matches PyTorch GRUCellv2.forward) ----
    out32 = jax.block_until_ready(gru_cell_forward(x, h_pad, *p32[:4]))
    assert out32.shape == (batch, Hp)
    assert jnp.allclose(out32[:, :hidden_size], ref, atol=1e-5, rtol=1e-5)
    assert jnp.all(out32[:, hidden_size:] == 0.0)          # padded-lane invariant

    out_bf = jax.block_until_ready(gru_cell_forward(x, h_pad, *pbf[:4]))
    assert jnp.allclose(out_bf[:, :hidden_size], ref, atol=6e-2, rtol=6e-2)

    # ---- sequence: hoisted input projection + timestep-blocked recurrence ----
    xs = jax.random.normal(ks, (seq_len, batch, input_size), jnp.float32)
    hs_ref = reference_sequence(xs, h, wx, wh, bx, bh)

    hs32 = jax.block_until_ready(gru_sequence_forward(xs, h_pad, *p32[:4]))
    assert hs32.shape == (seq_len, batch, Hp)
    assert jnp.allclose(hs32[:, :, :hidden_size], hs_ref, atol=1e-4, rtol=1e-4)
    assert jnp.all(hs32[:, :, hidden_size:] == 0.0)        # padded-lane invariant

    hs_bf = jax.block_until_ready(gru_sequence_forward(xs, h_pad, *pbf[:4]))
    assert jnp.allclose(hs_bf[:, :, :hidden_size], hs_ref, atol=1e-1, rtol=1e-1)

    print("KERNEL_OK")
</pallas_src>

<mosaic_0001>
module attributes {stable_mosaic.version = 11 : i64} {
  func.func @gru_cell_kernel(%arg0: memref<8x16xf32, #tpu.memory_space<vmem>>, %arg1: memref<8x128xf32, #tpu.memory_space<vmem>>, %arg2: memref<16x384xf32, #tpu.memory_space<vmem>>, %arg3: memref<128x384xf32, #tpu.memory_space<vmem>>, %arg4: memref<1x384xf32, #tpu.memory_space<vmem>>, %arg5: memref<1x128xf32, #tpu.memory_space<vmem>>, %arg6: memref<8x128xf32, #tpu.memory_space<vmem>>) attributes {dimension_semantics = [], scalar_prefetch = 0 : i64, scratch_operands = 0 : i64, tpu.core_type = #tpu.core_type<tc>} {
    %c0 = arith.constant 0 : index
    %c0_0 = arith.constant 0 : index
    %0 = vector.load %arg1[%c0, %c0_0] : memref<8x128xf32, #tpu.memory_space<vmem>>, vector<8x128xf32>
    %c0_1 = arith.constant 0 : index
    %c0_2 = arith.constant 0 : index
    %1 = vector.load %arg0[%c0_1, %c0_2] : memref<8x16xf32, #tpu.memory_space<vmem>>, vector<8x16xf32>
    %c0_3 = arith.constant 0 : index
    %c0_4 = arith.constant 0 : index
    %2 = vector.load %arg2[%c0_3, %c0_4] : memref<16x384xf32, #tpu.memory_space<vmem>>, vector<16x384xf32>
    %cst = arith.constant dense<0.000000e+00> : vector<8x384xf32>
    %3 = tpu.matmul %1, %2, %cst {dimension_numbers = #tpu.dot_dimension_numbers<[1], [0], [0], [1], [0, 0, 1, 1], [], []>} : vector<8x16xf32>, vector<16x384xf32>, vector<8x384xf32> -> vector<8x384xf32>
    %c0_5 = arith.constant 0 : index
    %c0_6 = arith.constant 0 : index
    %4 = vector.load %arg4[%c0_5, %c0_6] : memref<1x384xf32, #tpu.memory_space<vmem>>, vector<1x384xf32>
    %5 = vector.broadcast %4 : vector<1x384xf32> to vector<8x384xf32>
    %6 = arith.addf %3, %5 : vector<8x384xf32>
    %c0_7 = arith.constant 0 : index
    %c0_8 = arith.constant 0 : index
    %7 = vector.load %arg3[%c0_7, %c0_8] : memref<128x384xf32, #tpu.memory_space<vmem>>, vector<128x384xf32>
    %cst_9 = arith.constant dense<0.000000e+00> : vector<8x384xf32>
    %8 = tpu.matmul %0, %7, %cst_9 {dimension_numbers = #tpu.dot_dimension_numbers<[1], [0], [0], [1], [0, 0, 1, 1], [], []>} : vector<8x128xf32>, vector<128x384xf32>, vector<8x384xf32> -> vector<8x384xf32>
    %9 = vector.extract_strided_slice %6 {offsets = [0, 0], sizes = [8, 256], strides = [1, 1]} : vector<8x384xf32> to vector<8x256xf32>
    %10 = vector.extract_strided_slice %8 {offsets = [0, 0], sizes = [8, 256], strides = [1, 1]} : vector<8x384xf32> to vector<8x256xf32>
    %11 = arith.addf %9, %10 : vector<8x256xf32>
    %cst_10 = arith.constant 5.000000e-01 : f32
    %12 = vector.broadcast %cst_10 : f32 to vector<8x256xf32>
    %13 = arith.mulf %12, %11 : vector<8x256xf32>
    %14 = math.tanh %13 : vector<8x256xf32>
    %cst_11 = arith.constant 1.000000e+00 : f32
    %15 = vector.broadcast %cst_11 : f32 to vector<8x256xf32>
    %16 = arith.addf %14, %15 : vector<8x256xf32>
    %cst_12 = arith.constant 5.000000e-01 : f32
    %17 = vector.broadcast %cst_12 : f32 to vector<8x256xf32>
    %18 = arith.mulf %17, %16 : vector<8x256xf32>
    %19 = vector.extract_strided_slice %18 {offsets = [0, 0], sizes = [8, 128], strides = [1, 1]} : vector<8x256xf32> to vector<8x128xf32>
    %20 = vector.extract_strided_slice %18 {offsets = [0, 128], sizes = [8, 128], strides = [1, 1]} : vector<8x256xf32> to vector<8x128xf32>
    %21 = vector.extract_strided_slice %6 {offsets = [0, 256], sizes = [8, 128], strides = [1, 1]} : vector<8x384xf32> to vector<8x128xf32>
    %22 = vector.extract_strided_slice %8 {offsets = [0, 256], sizes = [8, 128], strides = [1, 1]} : vector<8x384xf32> to vector<8x128xf32>
    %c0_13 = arith.constant 0 : index
    %c0_14 = arith.constant 0 : index
    %23 = vector.load %arg5[%c0_13, %c0_14] : memref<1x128xf32, #tpu.memory_space<vmem>>, vector<1x128xf32>
    %24 = vector.broadcast %23 : vector<1x128xf32> to vector<8x128xf32>
    %25 = arith.addf %22, %24 : vector<8x128xf32>
    %26 = arith.mulf %19, %25 : vector<8x128xf32>
    %27 = arith.addf %21, %26 : vector<8x128xf32>
    %28 = math.tanh %27 : vector<8x128xf32>
    %cst_15 = arith.constant 1.000000e+00 : f32
    %29 = vector.broadcast %cst_15 : f32 to vector<8x128xf32>
    %30 = arith.subf %29, %20 : vector<8x128xf32>
    %31 = arith.mulf %30, %28 : vector<8x128xf32>
    %32 = arith.mulf %20, %0 : vector<8x128xf32>
    %33 = arith.addf %31, %32 : vector<8x128xf32>
    %c0_16 = arith.constant 0 : index
    %c0_17 = arith.constant 0 : index
    %34 = vector.load %arg6[%c0_16, %c0_17] : memref<8x128xf32, #tpu.memory_space<vmem>>, vector<8x128xf32>
    tpu.vector_store %arg6[%c0_16, %c0_17], %33 {strides = array<i32>} : memref<8x128xf32, #tpu.memory_space<vmem>>, vector<8x128xf32>,
    return
  }
}

</mosaic_0001>

<bundles_post_ra>
// kernel: tpu_custom_call.1
= control target key start
LH: loop header
LB: loop body
LE: loop exit
PB: predicated region body
PF: predicated region fallthrough
CT: control target
= control target key end

     0   :  { %11 = vsyncpa [#allocation3], 0  ;;  %s529_s0 = inlined_call_operand.hbm [shape: f32[8,16], index: 0, kind: input, shape index: {}]   ;;  %s530_s1 = inlined_call_operand.hbm [shape: f32[8,128], index: 1, kind: input, shape index: {}]   ;;  %s531_s2 = inlined_call_operand.hbm [shape: f32[16,384], index: 2, kind: input, shape index: {}]   ;;  %s532_s3 = inlined_call_operand.hbm [shape: f32[128,384], index: 3, kind: input, shape index: {}]   ;;  %s533_s4 = inlined_call_operand.vmem [shape: f32[1,384], index: 4, kind: input, shape index: {}]   ;;  %s534_s5 = inlined_call_operand.vmem [shape: f32[1,128], index: 5, kind: input, shape index: {}]   ;;  %s535_s6 = inlined_call_operand.hbm [shape: f32[8,128], index: 6, kind: output, shape index: {}]  }
   0x1   :  { %12 = vsyncpa [#allocation6], 0 }
   0x2   :  { %13 = vsyncpa [#allocation9], 0  ;;  %s31_s23 = sshll.u32 %s530_s1, 4  ;;  %s32_s23 = int_to_ptr.hbm [resolvable:$true] %s31_s23 }
   0x3   :  { %14 = vsyncpa [#allocation4], 0  ;;  %s458_s24 = smov [#allocation5]   ;;  %s20_s28 = sshll.u32 %s529_s0, 4  ;;  %s21_s28 = int_to_ptr.hbm [resolvable:$true] %s20_s28 }
   0x4   :  { %s33_s25 = sshll.u32 %s458_s24, 4  ;;  %s459_s29 = smov [#allocation2]   ;;  %s34_s25 = int_to_ptr.vmem [resolvable:$true] %s33_s25 }
   0x5   :  { %36 = dma.hbm_to_vmem [thread:$0]  %s32_s23, 128, %s34_s25, [#allocation6]  }
   0x6   :  { %s22_s30 = sshll.u32 %s459_s29, 4  ;;  %s41_s9 = sshll.u32 %s531_s2, 4  ;;  %s23_s30 = int_to_ptr.vmem [resolvable:$true] %s22_s30  ;;  %s42_s9 = int_to_ptr.hbm [resolvable:$true] %s41_s9 }
   0x7   :  { %25 = dma.hbm_to_vmem [thread:$0]  %s21_s28, 128, %s23_s30, [#allocation3]  }
   0x8   :  { %s460_s1 = smov [#allocation7]   ;;  %s54_s13 = sshll.u32 %s532_s3, 4  ;;  %s55_s13 = int_to_ptr.hbm [resolvable:$true] %s54_s13 }
   0x9   :  { %s43_s10 = sshll.u32 %s460_s1, 4  ;;  %s461_s14 = smov 384   ;;  %s44_s10 = int_to_ptr.vmem [resolvable:$true] %s43_s10 }
   0xa   :  { %s462_s0 = smov 24   ;;  %s463_s15 = smov [#allocation8]  }
   0xb   :  { %49 = dma.hbm_to_vmem [thread:$0]  %s42_s9, 768, %s44_s10, [#allocation6], %s461_s14, %s461_s14, %s462_s0  }
   0xc   :  { %s56_s16 = sshll.u32 %s463_s15, 4  ;;  %s57_s16 = int_to_ptr.vmem [resolvable:$true] %s56_s16 }
   0xd   :  { %62 = dma.hbm_to_vmem [thread:$0]  %s55_s13, 6144, %s57_s16, [#allocation9], %s461_s14, %s461_s14, %s462_s0  }
   0xe   :  { %450 = dma.done.wait [#allocation3], 128  }
   0xf   :  { %451 = vsyncadd [#allocation3], 4294967168 }
  0x10   :  { %452 = dma.done.wait [#allocation6], 896  }
  0x11   :  { %453 = vsyncadd [#allocation6], 4294966400 }
  0x12   :  { %454 = dma.done.wait [#allocation9], 6144  }
  0x13   :  { %455 = vsyncadd [#allocation9], 4294961152  ;;  %v208_v0 = vld [vmem:[#allocation8 + $0x168] sm:$0xff]  ;;  %v205_v1 = vld [vmem:[#allocation8 + $0x150] sm:$0xff]  ;;  %vm99_vm0 = vcmask 130048   ;;  %s301_s21 = sshll.u32 %s535_s6, 4  ;;  %s302_s21 = int_to_ptr.hbm [resolvable:$true] %s301_s21 }
  0x14   :  { %211 = vmatpush.msra.mxu3 %v208_v0  ;;  %v202_v2 = vld [vmem:[#allocation8 + $0x138] sm:$0xff]  ;;  %v209_v3 = vld [vmem:[#allocation8 + $0x170] sm:$0xff]  ;;  %v199_v5 = vld [vmem:[#allocation8 + $0x120] sm:$0xff] }
  0x15   :  { %231 = vmatpush.msra.mxu0 %v209_v3  ;;  %v206_v4 = vld [vmem:[#allocation8 + $0x158] sm:$0xff]  ;;  %v203_v6 = vld [vmem:[#allocation8 + $0x140] sm:$0xff]  ;;  %v196_v9 = vld [vmem:[#allocation8 + $0x108] sm:$0xff] }
  0x16   :  { %212 = vmatpush.msra.mxu3 %v205_v1  ;;  %v210_v7 = vld [vmem:[#allocation8 + $0x178] sm:$0xff]  ;;  %v207_v8 = vld [vmem:[#allocation8 + $0x160] sm:$0xff]  ;;  %v200_v10 = vld [vmem:[#allocation8 + $0x128] sm:$0xff] }
  0x17   :  { %232 = vmatpush.msra.mxu0 %v206_v4  ;;  %251 = vmatpush.msra.mxu1 %v210_v7  ;;  %v204_v11 = vld [vmem:[#allocation8 + $0x148] sm:$0xff]  ;;  %v193_v13 = vld [vmem:[#allocation8 + $0xf0] sm:$0xff]  ;;  %v512_v17 = vld [vmem:[#allocation2] sm:$0xff] }
  0x18   :  { %213 = vmatpush.msra.mxu3 %v202_v2  ;;  %v88_v12 = vld [vmem:[#allocation7 + $0x18] sm:$0xff]  ;;  %v197_v14 = vld [vmem:[#allocation8 + $0x110] sm:$0xff]  ;;  %v190_v18 = vld [vmem:[#allocation8 + $0xd8] sm:$0xff] }
  0x19   :  { %233 = vmatpush.msra.mxu0 %v203_v6  ;;  %252 = vmatpush.msra.mxu1 %v207_v8  ;;  %v201_v15 = vld [vmem:[#allocation8 + $0x130] sm:$0xff]  ;;  %v194_v19 = vld [vmem:[#allocation8 + $0xf8] sm:$0xff]  ;;  %v187_v22 = vld [vmem:[#allocation8 + $0xc0] sm:$0xff] }
  0x1a   :  { %214 = vmatpush.msra.mxu3 %v199_v5  ;;  %117 = vmatpush.msra.mxu2 %v88_v12  ;;  %v85_v16 = vld [vmem:[#allocation7] sm:$0xff]  ;;  %v198_v20 = vld [vmem:[#allocation8 + $0x118] sm:$0xff]  ;;  %v191_v23 = vld [vmem:[#allocation8 + $0xe0] sm:$0xff] }
  0x1b   :  { %234 = vmatpush.msra.mxu0 %v200_v10  ;;  %253 = vmatpush.msra.mxu1 %v204_v11  ;;  %v89_v21 = vld [vmem:[#allocation7 + $0x20] sm:$0xff]  ;;  %v195_v24 = vld [vmem:[#allocation8 + $0x100] sm:$0xff]  ;;  %v86_v25 = vld [vmem:[#allocation7 + $0x8] sm:$0xff] }
  0x1c   :  { %215 = vmatpush.msra.mxu3 %v196_v9  ;;  %118 = vmatpush.msra.mxu2 %v85_v16  ;;  %v184_v26 = vld [vmem:[#allocation8 + $0xa8] sm:$0xff]  ;;  %v90_v29 = vld [vmem:[#allocation7 + $0x28] sm:$0xff]  ;;  %v181_v30 = vld [vmem:[#allocation8 + $0x90] sm:$0xff] }
  0x1d   :  { %235 = vmatpush.msra.mxu0 %v197_v14  ;;  %254 = vmatpush.msra.mxu1 %v201_v15  ;;  %v188_v27 = vld [vmem:[#allocation8 + $0xc8] sm:$0xff]  ;;  %v185_v31 = vld [vmem:[#allocation8 + $0xb0] sm:$0xff]  ;;  %v178_v33 = vld [vmem:[#allocation8 + $0x78] sm:$0xff] }
  0x1e   :  { %216 = vmatpush.msra.mxu3 %v193_v13  ;;  %313 = vmatmul.msk.f32.vlgmr.msra.gmra.mxu2 %vm99_vm0, %v512_v17  ;;  %v192_v28 = vld [vmem:[#allocation8 + $0xe8] sm:$0xff]  ;;  %v189_v32 = vld [vmem:[#allocation8 + $0xd0] sm:$0xff]  ;;  %v182_v34 = vld [vmem:[#allocation8 + $0x98] sm:$0xff] }
  0x1f   :  { %236 = vmatpush.msra.mxu0 %v194_v19  ;;  %255 = vmatpush.msra.mxu1 %v198_v20  ;;  %v186_v35 = vld [vmem:[#allocation8 + $0xb8] sm:$0xff]  ;;  %v87_v36 = vld [vmem:[#allocation7 + $0x10] sm:$0xff]  ;;  %v172_v40 = vld [vmem:[#allocation8 + $0x48] sm:$0xff] }
  0x20   :  { %217 = vmatpush.msra.mxu3 %v190_v18  ;;  %137 = vmatpush.msrb.mxu2 %v89_v21  ;;  %v175_v37 = vld [vmem:[#allocation8 + $0x60] sm:$0xff]  ;;  %v176_v41 = vld [vmem:[#allocation8 + $0x68] sm:$0xff]  ;;  %v169_v43 = vld [vmem:[#allocation8 + $0x30] sm:$0xff] }
  0x21   :  { %237 = vmatpush.msra.mxu0 %v191_v23  ;;  %256 = vmatpush.msra.mxu1 %v195_v24  ;;  %v179_v38 = vld [vmem:[#allocation8 + $0x80] sm:$0xff]  ;;  %v180_v42 = vld [vmem:[#allocation8 + $0x88] sm:$0xff]  ;;  %v173_v44 = vld [vmem:[#allocation8 + $0x50] sm:$0xff] }
  0x22   :  { %218 = vmatpush.msra.mxu3 %v187_v22  ;;  %138 = vmatpush.msrb.mxu2 %v86_v25  ;;  %v183_v39 = vld [vmem:[#allocation8 + $0xa0] sm:$0xff]  ;;  %v177_v45 = vld [vmem:[#allocation8 + $0x70] sm:$0xff]  ;;  %v166_v46 = vld [vmem:[#allocation8 + $0x18] sm:$0xff] }
  0x23   :  { %238 = vmatpush.msra.mxu0 %v188_v27  ;;  %257 = vmatpush.msra.mxu1 %v192_v28  ;;  %v170_v47 = vld [vmem:[#allocation8 + $0x38] sm:$0xff]  ;;  %v163_v49 = vld [vmem:[#allocation8] sm:$0xff]  ;;  %v83_v51 = vld [vmem:[#allocation5] sm:$0xff] }
  0x24   :  { %219 = vmatpush.msra.mxu3 %v184_v26  ;;  %157 = vmatpush.msra.mxu2 %v90_v29  ;;  %v174_v48 = vld [vmem:[#allocation8 + $0x58] sm:$0xff]  ;;  %v167_v50 = vld [vmem:[#allocation8 + $0x20] sm:$0xff]  ;;  %v164_v53 = vld [vmem:[#allocation8 + $0x8] sm:$0xff] }
  0x25   :  { %239 = vmatpush.msra.mxu0 %v185_v31  ;;  %258 = vmatpush.msra.mxu1 %v189_v32  ;;  %v171_v52 = vld [vmem:[#allocation8 + $0x40] sm:$0xff]  ;;  %v168_v54 = vld [vmem:[#allocation8 + $0x28] sm:$0xff]  ;;  %v165_v55 = vld [vmem:[#allocation8 + $0x10] sm:$0xff] }
  0x26   :  { %220 = vmatpush.msra.mxu3 %v181_v30  ;;  %314 = vmatmul.msk.f32.vlgmr.msrb.gmra.mxu2 %vm99_vm0, %v512_v17  ;;  %v91_v57 = vld [vmem:[%s533_s4] sm:$0x7]  ;;  %s464_s4 = smov [#allocation10]  }
  0x27   :  { %240 = vmatpush.msra.mxu0 %v182_v34  ;;  %259 = vmatpush.msra.mxu1 %v186_v35  ;;  %v94_v58 = vperm.slane %v91_v57, 1  ;;  %v93_v60 = vperm.slane %v91_v57, 0  ;;  %v323_v5 = vld [vmem:[%s534_s5] ss:$0 sm:$0xff]  ;;  %v95_v7 = vperm.slane %v91_v57, 2  ;;  %s299_s19 = sshll.u32 %s464_s4, 4  ;;  %s300_s19 = int_to_ptr.vmem [resolvable:$true] %s299_s19 }
  0x28   :  { %221 = vmatpush.msra.mxu3 %v178_v33  ;;  %158 = vmatpush.msra.mxu2 %v87_v36 }
  0x29   :  { %241 = vmatpush.msra.mxu0 %v179_v38  ;;  %260 = vmatpush.msra.mxu1 %v183_v39 }
  0x2a   :  { %222 = vmatpush.msra.mxu3 %v175_v37 }
  0x2b   :  { %242 = vmatpush.msra.mxu0 %v176_v41  ;;  %261 = vmatpush.msra.mxu1 %v180_v42 }
  0x2c   :  { %223 = vmatpush.msra.mxu3 %v172_v40 }
  0x2d   :  { %243 = vmatpush.msra.mxu0 %v173_v44  ;;  %262 = vmatpush.msra.mxu1 %v177_v45 }
  0x2e   :  { %224 = vmatpush.msra.mxu3 %v169_v43  ;;  %315 = vmatmul.msk.f32.vlgmr.msra.gmra.mxu2 %vm99_vm0, %v512_v17 }
  0x2f   :  { %244 = vmatpush.msra.mxu0 %v170_v47  ;;  %263 = vmatpush.msra.mxu1 %v174_v48 }
  0x30   :  { %225 = vmatpush.msra.mxu3 %v166_v46 }
  0x31   :  { %245 = vmatpush.msra.mxu0 %v167_v50  ;;  %264 = vmatpush.msra.mxu1 %v171_v52 }
  0x32   :  { %226 = vmatpush.msra.mxu3 %v163_v49 }
  0x33   :  { %227 = vmatmul.f32.vlgmr.msra.gmra.mxu3 %v83_v51  ;;  %246 = vmatpush.msra.mxu0 %v164_v53 }
  0x34   :  { %247 = vmatmul.f32.vlgmr.msra.gmra.mxu0 %v83_v51  ;;  %265 = vmatpush.msra.mxu1 %v168_v54 }
  0x36   :  { %266 = vmatpush.msra.mxu1 %v165_v55 }
  0x37   :  { %267 = vmatmul.f32.vlgmr.msra.gmra.mxu1 %v83_v51 }
  0xa1   :  { %v120_v56 = vpop.f32.mrf.mxu2 }
  0xa2   :  { %v121_v63 = vadd.f32 %v120_v56, %v93_v60 }
  0xa9   :  { %v140_v59 = vpop.f32.mrf.mxu2 }
  0xaa   :  { %v141_v61 = vadd.f32 %v140_v59, %v94_v58 }
  0xb1   :  { %v248_v62 = vpop.f32.mrf.mxu0  ;;  %v160_v9 = vpop.f32.mrf.mxu2 }
  0xb2   :  { %v272_v0 = vadd.f32 %v248_v62, %v141_v61  ;;  %v161_v14 = vadd.f32 %v160_v9, %v95_v7 }
  0xb4   :  { %v274_v3 = vmul.f32 0.5, %v272_v0  ;;  %v268_v6 = vpop.f32.mrf.mxu1 }
  0xb5   :  { %v285_v12 = vadd.f32 %v323_v5, %v268_v6 }
  0xb6   :  { %v228_v1 = vpop.f32.mrf.mxu3 }
  0xb7   :  { %v271_v2 = vadd.f32 %v228_v1, %v121_v63 }
  0xb9   :  { %v273_v4 = vmul.f32 0.5, %v271_v2 }
  0xbb   :  { %324 = vtanh.f32 %v273_v4 }
  0xbc   :  { %326 = vtanh.f32 %v274_v3 }
  0xc1   :  { %v325_v8 = vpop.eup %324 }
  0xc2   :  { %v327_v10 = vpop.eup %326  ;;  %v277_v11 = vadd.f32 1.0, %v325_v8 }
  0xc3   :  { %v278_v15 = vadd.f32 1.0, %v327_v10 }
  0xc4   :  { %v279_v13 = vmul.f32 0.5, %v277_v11 }
  0xc5   :  { %v280_v18 = vmul.f32 0.5, %v278_v15 }
  0xc6   :  { %v286_v16 = vmul.f32 %v285_v12, %v279_v13 }
  0xc7   :  { %v289_v19 = vsub.f32 1.0, %v280_v18  ;;  %v291_v21 = vmul.f32 %v280_v18, %v83_v51 }
  0xc8   :  { %v287_v17 = vadd.f32 %v286_v16, %v161_v14 }
  0xca   :  { %328 = vtanh.f32 %v287_v17 }
  0xd0   :  { %v329_v20 = vpop.eup %328 }
  0xd1   :  { %v290_v22 = vmul.f32 %v329_v20, %v289_v19 }
  0xd3   :  { %v292_v23 = vadd.f32 %v291_v21, %v290_v22 }
  0xd5   :  { %293 = vst [vmem:[#allocation10] sm:$0xff] %v292_v23 }
  0xd6   :  { %304 = dma.vmem_to_hbm [thread:$0]  %s300_s19, 128, %s302_s21, [#allocation4]  }
  0xd7   :  { %456 = dma.done.wait [#allocation4], 128  }
  0xd8   :  { %457 = vsyncadd [#allocation4], 4294967168 }
  0xd9   :  { %309 = vsyncpa [#allocation3], 1 }
  0xda   :  { %310 = vsyncpa [#allocation6], 1 }
  0xdb   :  { %311 = vsyncpa [#allocation9], 1 }
  0xdc   :  { %312 = vsyncpa [#allocation4], 1 }

</bundles_post_ra>
